<compile_context>
chip_gen: v7x
topology: tpu7x:2x2x1
jax: 0.10.0
libtpu: 0.0.40
codegen_flags: <defaults>
</compile_context>

<pallas_src>
import functools

import numpy as np
import jax
import jax.numpy as jnp
from jax.experimental import pallas as pl
from jax.experimental.pallas import tpu as pltpu


def riqn_kernel(expand_ref, state_ref, hx_ref, tau_ref,
                w1_ref, wih_ref, whh_ref, wphi_ref, w2_ref, w3_ref, const_ref,
                out_ref, ghx_ref, *, H1, G, F, Q):
    f32 = jnp.float32
    md = w1_ref.dtype                      # MXU input dtype (bf16 by default)

    # Packed constants: one operand, every slice starts at lane 0.
    b1   = const_ref[0:1, 0:H1]
    bih  = const_ref[1:2, 0:3 * G]
    bhh  = const_ref[2:3, 0:3 * G]
    bphi = const_ref[3:4, 0:G]
    b2   = const_ref[4:5, 0:G]
    b3   = const_ref[5:6, 0:F]
    pi_q = const_ref[6:7, 0:Q]

    hx = hx_ref[...]                                                    # (MT, G) f32

    # ---- quantile-invariant work: TB batch rows, not TB*N ------------------
    xb = jnp.dot(state_ref[...].astype(md), w1_ref[...],
                 preferred_element_type=f32) + b1
    xb = jnp.maximum(xb, 0.0)                                           # (TB, H1)
    gi_b = jnp.dot(xb.astype(md), wih_ref[...],
                   preferred_element_type=f32)                          # (TB, 3G)
    # Expand each batch row to its num_quantiles rows with one 0/1 matmul.
    gi = jnp.dot(expand_ref[...], gi_b, preferred_element_type=f32) + bih   # (MT, 3G)

    # ---- GRUCell, fused 3G projections, PyTorch gate order (r, z, n) -------
    gh = jnp.dot(hx.astype(md), whh_ref[...],
                 preferred_element_type=f32) + bhh                      # (MT, 3G)
    r  = jax.nn.sigmoid(gi[:, 0:G]         + gh[:, 0:G])
    zg = jax.nn.sigmoid(gi[:, G:2 * G]     + gh[:, G:2 * G])
    n  = jnp.tanh(gi[:, 2 * G:3 * G] + r * gh[:, 2 * G:3 * G])
    ghx = (1.0 - zg) * n + zg * hx                                      # (MT, G) f32

    # ---- quantile embedding: phi = relu(cos(tau * pi * q) @ Wphi + b) ------
    cos_tau = jnp.cos(tau_ref[...] * pi_q)                              # (MT, Q)
    phi = jnp.dot(cos_tau.astype(md), wphi_ref[...],
                  preferred_element_type=f32) + bphi
    phi = jnp.maximum(phi, 0.0)                                         # (MT, G)

    # ---- residual head: out = fc_3((ghx + relu(fc_2(ghx))) * phi) ----------
    y = jnp.dot(ghx.astype(md), w2_ref[...], preferred_element_type=f32) + b2
    y = ghx + jnp.maximum(y, 0.0)
    out = jnp.dot((y * phi).astype(md), w3_ref[...],
                  preferred_element_type=f32) + b3

    out_ref[...] = out                                                  # (MT, F)
    ghx_ref[...] = ghx                                                  # (MT, G)


def _pick_batch_tile(B, N, F, G, H1, Q, *, target_rows=512,
                     vmem_budget_bytes=16 << 20):
    """Batch elements per grid step.  Rows per step = TB * N."""
    weight_elems = F * H1 + H1 * 3 * G + G * 3 * G + Q * G + G * G + G * F
    const_elems = 7 * max(H1, 3 * G, G, F, Q)

    def est_vmem(tb):
        mt = tb * N
        block_elems = mt * tb + tb * F + mt * G + mt + mt * F + mt * G
        return 8 * (block_elems + weight_elems + const_elems)   # x2 buffers, 4B

    if B * N <= target_rows and est_vmem(B) <= vmem_budget_bytes:
        # Small problem: one grid step, unless a clean 2-way split keeps both
        # v7x TensorCores well fed (>= 256 rows each).
        if B % 16 == 0 and (B // 2) * N >= 256:
            return B // 2
        return B

    tb = max(8, (target_rows // max(N, 1)) // 8 * 8)
    while tb > 8 and est_vmem(tb) > vmem_budget_bytes:
        tb -= 8
    if tb >= B:
        return B            # single step, full-array blocks
    return tb               # multiple of 8 -> aligned tiles on a cdiv grid


def riqn_forward(params, state, hx, tau, num_quantiles, *,
                 target_rows_per_step=512, mxu_dtype=jnp.bfloat16):
    """state: (B, 1, F) f32, hx: (B*N, G) f32, tau: (B*N, 1) f32."""
    f32 = jnp.float32
    B = state.shape[0]
    F, H1 = params["w1"].shape
    G = params["whh"].shape[0]
    Q = params["wphi"].shape[0]
    N = int(num_quantiles)
    M = B * N

    TB = _pick_batch_tile(B, N, F, G, H1, Q, target_rows=target_rows_per_step)
    n_steps = int(pl.cdiv(B, TB))
    B_pad = n_steps * TB
    MT = TB * N
    M_pad = B_pad * N

    state2d = state.reshape(B, F).astype(f32)
    hx_f = hx.astype(f32)
    tau2d = tau.reshape(M, 1).astype(f32)
    if B_pad != B:                       # pad to full tiles (sliced off below)
        state2d = jnp.pad(state2d, ((0, B_pad - B), (0, 0)))
        hx_f = jnp.pad(hx_f, ((0, M_pad - M), (0, 0)))
        tau2d = jnp.pad(tau2d, ((0, M_pad - M), (0, 0)))

    # Constant quantile-expansion matrix: row b*N+j -> e_b  (same every tile).
    expand = jnp.repeat(jnp.eye(TB, dtype=f32), N, axis=0)              # (MT, TB)

    # All biases + the pi*arange(Q) row packed into one lane-0-aligned operand.
    W = max(H1, 3 * G, G, F, Q)

    def crow(v):
        v = jnp.asarray(v, f32).reshape(1, -1)
        return jnp.pad(v, ((0, 0), (0, W - v.shape[1])))

    consts = jnp.concatenate(
        [crow(params["b1"]), crow(params["bih"]), crow(params["bhh"]),
         crow(params["bphi"]), crow(params["b2"]), crow(params["b3"]),
         crow(np.pi * np.arange(Q, dtype=np.float32))], axis=0)         # (7, W)

    md = mxu_dtype
    weights = (params["w1"].astype(md), params["wih"].astype(md),
               params["whh"].astype(md), params["wphi"].astype(md),
               params["w2"].astype(md), params["w3"].astype(md))

    full = lambda i: (0, 0)
    row = lambda i: (i, 0)
    in_specs = [
        pl.BlockSpec((MT, TB), full),              # expand (constant)
        pl.BlockSpec((TB, F), row),                # state
        pl.BlockSpec((MT, G), row),                # hx
        pl.BlockSpec((MT, 1), row),                # tau
        pl.BlockSpec((F, H1), full),               # fc_1 weight
        pl.BlockSpec((H1, 3 * G), full),           # GRU input weight (fused r,z,n)
        pl.BlockSpec((G, 3 * G), full),            # GRU hidden weight (fused r,z,n)
        pl.BlockSpec((Q, G), full),                # phi weight
        pl.BlockSpec((G, G), full),                # fc_2 weight
        pl.BlockSpec((G, F), full),                # fc_3 weight
        pl.BlockSpec((7, W), full),                # packed biases + pi row
    ]
    out_specs = (pl.BlockSpec((MT, F), row), pl.BlockSpec((MT, G), row))
    out_shape = (jax.ShapeDtypeStruct((M_pad, F), f32),
                 jax.ShapeDtypeStruct((M_pad, G), f32))

    kernel = functools.partial(riqn_kernel, H1=H1, G=G, F=F, Q=Q)
    out, ghx = pl.pallas_call(
        kernel,
        grid=(n_steps,),
        in_specs=in_specs,
        out_specs=out_specs,
        out_shape=out_shape,
        input_output_aliases={2: 1},               # hx HBM buffer reused for ghx
        compiler_params=pltpu.CompilerParams(
            dimension_semantics=("parallel",),
            vmem_limit_bytes=48 * 1024 * 1024),
    )(expand, state2d, hx_f, tau2d, *weights, consts)

    out = out[:M]
    ghx = ghx[:M]
    z = out.reshape(B, N, F).transpose(0, 2, 1)    # (B, F, N) == z.transpose(1, 2)
    return z, ghx


def riqn_reference(params, state, hx, tau, num_quantiles):
    """Pure-JAX (HIGHEST-precision) reference of the torch forward."""
    dot = functools.partial(jnp.dot, precision=jax.lax.Precision.HIGHEST)
    B = state.shape[0]
    F = params["w1"].shape[0]
    G = params["whh"].shape[0]
    Q = params["wphi"].shape[0]
    M = B * num_quantiles
    pi_row = np.pi * jnp.arange(Q, dtype=jnp.float32)[None, :]
    cos_tau = jnp.cos(jnp.broadcast_to(tau.reshape(M, 1), (M, Q)) * pi_row)
    phi = jax.nn.relu(dot(cos_tau, params["wphi"]) + params["bphi"])
    st = jnp.broadcast_to(state.reshape(B, 1, F), (B, num_quantiles, F)).reshape(M, F)
    x = jax.nn.relu(dot(st, params["w1"]) + params["b1"])
    gi = dot(x, params["wih"]) + params["bih"]
    gh = dot(hx, params["whh"]) + params["bhh"]
    r = jax.nn.sigmoid(gi[:, :G] + gh[:, :G])
    zg = jax.nn.sigmoid(gi[:, G:2 * G] + gh[:, G:2 * G])
    n = jnp.tanh(gi[:, 2 * G:] + r * gh[:, 2 * G:])
    ghx = (1.0 - zg) * n + zg * hx
    y = ghx + jax.nn.relu(dot(ghx, params["w2"]) + params["b2"])
    out = dot(y * phi, params["w3"]) + params["b3"]
    return out.reshape(B, num_quantiles, F).transpose(0, 2, 1), ghx


def init_params(key, F, G, Q, H1):
    ks = jax.random.split(key, 12)

    def xavier(k, shape):  # (in, out), matches nn.init.xavier_uniform_
        bound = float(np.sqrt(6.0 / (shape[0] + shape[1])))
        return jax.random.uniform(k, shape, jnp.float32, -bound, bound)

    def unif(k, shape, bound):
        return jax.random.uniform(k, shape, jnp.float32, -bound, bound)

    gb = 1.0 / float(np.sqrt(G))
    return dict(
        w1=xavier(ks[0], (F, H1)),   b1=unif(ks[1], (1, H1), 1.0 / np.sqrt(F)),
        wih=unif(ks[2], (H1, 3 * G), gb), bih=unif(ks[3], (1, 3 * G), gb),
        whh=unif(ks[4], (G, 3 * G), gb),  bhh=unif(ks[5], (1, 3 * G), gb),
        w2=xavier(ks[6], (G, G)),    b2=unif(ks[7], (1, G), gb),
        w3=xavier(ks[8], (G, F)),    b3=unif(ks[9], (1, F), gb),
        wphi=xavier(ks[10], (Q, G)), bphi=unif(ks[11], (1, G), 1.0 / np.sqrt(Q)),
    )


if __name__ == "__main__":
    # feature_len=16, gru_size=32, quantile_embedding_dim=64,
    # num_quantiles=8, fc1_units=64, batch=2
    B, N, F, G, Q, H1 = 2, 8, 16, 32, 64, 64
    key = jax.random.PRNGKey(0)
    k1, k2, k3, kp = jax.random.split(key, 4)

    state = jax.random.normal(k1, (B, 1, F), jnp.float32)
    hx = jax.random.normal(k2, (B * N, G), jnp.float32)
    tau = jax.random.uniform(k3, (B * N, 1), jnp.float32)
    params = init_params(kp, F, G, Q, H1)

    z_ref, ghx_ref = riqn_reference(params, state, hx, tau, N)

    fwd = jax.jit(functools.partial(riqn_forward, num_quantiles=N))
    z, ghx = fwd(params, state, hx, tau)
    jax.block_until_ready((z, ghx))

    assert z.shape == (B, F, N) and ghx.shape == (B * N, G)
    # Kernel uses bf16 MXU inputs (f32 accumulation); reference is f32 HIGHEST,
    # so allow ~1e-2-scale slack (real structural bugs produce O(0.1-1) errors).
    np.testing.assert_allclose(np.asarray(z), np.asarray(z_ref), rtol=2e-2, atol=2e-2)
    np.testing.assert_allclose(np.asarray(ghx), np.asarray(ghx_ref), rtol=2e-2, atol=2e-2)

    print("KERNEL_OK")
</pallas_src>

<mosaic_0001>
module attributes {stable_mosaic.version = 11 : i64} {
  func.func @riqn_kernel(%arg0: i32, %arg1: memref<16x2xf32, #tpu.memory_space<vmem>>, %arg2: memref<2x16xf32, #tpu.memory_space<vmem>>, %arg3: memref<16x32xf32, #tpu.memory_space<vmem>>, %arg4: memref<16x1xf32, #tpu.memory_space<vmem>>, %arg5: memref<16x64xbf16, #tpu.memory_space<vmem>>, %arg6: memref<64x96xbf16, #tpu.memory_space<vmem>>, %arg7: memref<32x96xbf16, #tpu.memory_space<vmem>>, %arg8: memref<64x32xbf16, #tpu.memory_space<vmem>>, %arg9: memref<32x32xbf16, #tpu.memory_space<vmem>>, %arg10: memref<32x16xbf16, #tpu.memory_space<vmem>>, %arg11: memref<7x96xf32, #tpu.memory_space<vmem>>, %arg12: memref<16x16xf32, #tpu.memory_space<vmem>>, %arg13: memref<16x32xf32, #tpu.memory_space<vmem>>) attributes {dimension_semantics = [#tpu.dimension_semantics<parallel>], iteration_bounds = array<i64: 1>, scalar_prefetch = 0 : i64, scratch_operands = 0 : i64, tpu.core_type = #tpu.core_type<tc>, window_params = [{pipeline_mode = #tpu.pipeline_mode<synchronous>, transform_indices = @transform_0, window_bounds = array<i64: 16, 2>}, {transform_indices = @transform_1, window_bounds = array<i64: 2, 16>}, {transform_indices = @transform_2, window_bounds = array<i64: 16, 32>}, {transform_indices = @transform_3, window_bounds = array<i64: 16, 1>}, {pipeline_mode = #tpu.pipeline_mode<synchronous>, transform_indices = @transform_4, window_bounds = array<i64: 16, 64>}, {pipeline_mode = #tpu.pipeline_mode<synchronous>, transform_indices = @transform_5, window_bounds = array<i64: 64, 96>}, {pipeline_mode = #tpu.pipeline_mode<synchronous>, transform_indices = @transform_6, window_bounds = array<i64: 32, 96>}, {pipeline_mode = #tpu.pipeline_mode<synchronous>, transform_indices = @transform_7, window_bounds = array<i64: 64, 32>}, {pipeline_mode = #tpu.pipeline_mode<synchronous>, transform_indices = @transform_8, window_bounds = array<i64: 32, 32>}, {pipeline_mode = #tpu.pipeline_mode<synchronous>, transform_indices = @transform_9, window_bounds = array<i64: 32, 16>}, {pipeline_mode = #tpu.pipeline_mode<synchronous>, transform_indices = @transform_10, window_bounds = array<i64: 7, 96>}, {transform_indices = @transform_11, window_bounds = array<i64: 16, 16>}, {transform_indices = @transform_12, window_bounds = array<i64: 16, 32>}]} {
    %c0 = arith.constant 0 : index
    %c0_0 = arith.constant 0 : index
    %0 = vector.load %arg11[%c0, %c0_0] : memref<7x96xf32, #tpu.memory_space<vmem>>, vector<1x64xf32>
    %c1 = arith.constant 1 : index
    %c0_1 = arith.constant 0 : index
    %1 = vector.load %arg11[%c1, %c0_1] : memref<7x96xf32, #tpu.memory_space<vmem>>, vector<1x96xf32>
    %c2 = arith.constant 2 : index
    %c0_2 = arith.constant 0 : index
    %2 = vector.load %arg11[%c2, %c0_2] : memref<7x96xf32, #tpu.memory_space<vmem>>, vector<1x96xf32>
    %c3 = arith.constant 3 : index
    %c0_3 = arith.constant 0 : index
    %3 = vector.load %arg11[%c3, %c0_3] : memref<7x96xf32, #tpu.memory_space<vmem>>, vector<1x32xf32>
    %c4 = arith.constant 4 : index
    %c0_4 = arith.constant 0 : index
    %4 = vector.load %arg11[%c4, %c0_4] : memref<7x96xf32, #tpu.memory_space<vmem>>, vector<1x32xf32>
    %c5 = arith.constant 5 : index
    %c0_5 = arith.constant 0 : index
    %5 = vector.load %arg11[%c5, %c0_5] : memref<7x96xf32, #tpu.memory_space<vmem>>, vector<1x16xf32>
    %c6 = arith.constant 6 : index
    %c0_6 = arith.constant 0 : index
    %6 = vector.load %arg11[%c6, %c0_6] : memref<7x96xf32, #tpu.memory_space<vmem>>, vector<1x64xf32>
    %c0_7 = arith.constant 0 : index
    %c0_8 = arith.constant 0 : index
    %7 = vector.load %arg3[%c0_7, %c0_8] : memref<16x32xf32, #tpu.memory_space<vmem>>, vector<16x32xf32>
    %c0_9 = arith.constant 0 : index
    %c0_10 = arith.constant 0 : index
    %8 = vector.load %arg2[%c0_9, %c0_10] : memref<2x16xf32, #tpu.memory_space<vmem>>, vector<2x16xf32>
    %9 = arith.truncf %8 : vector<2x16xf32> to vector<2x16xbf16>
    %c0_11 = arith.constant 0 : index
    %c0_12 = arith.constant 0 : index
    %10 = vector.load %arg5[%c0_11, %c0_12] : memref<16x64xbf16, #tpu.memory_space<vmem>>, vector<16x64xbf16>
    %cst = arith.constant dense<0.000000e+00> : vector<2x64xf32>
    %11 = tpu.matmul %9, %10, %cst {dimension_numbers = #tpu.dot_dimension_numbers<[1], [0], [0], [1], [0, 0, 1, 1], [], []>} : vector<2x16xbf16>, vector<16x64xbf16>, vector<2x64xf32> -> vector<2x64xf32>
    %12 = vector.broadcast %0 : vector<1x64xf32> to vector<2x64xf32>
    %13 = arith.addf %11, %12 : vector<2x64xf32>
    %cst_13 = arith.constant 0.000000e+00 : f32
    %14 = vector.broadcast %cst_13 : f32 to vector<2x64xf32>
    %15 = arith.maximumf %13, %14 : vector<2x64xf32>
    %16 = arith.truncf %15 : vector<2x64xf32> to vector<2x64xbf16>
    %c0_14 = arith.constant 0 : index
    %c0_15 = arith.constant 0 : index
    %17 = vector.load %arg6[%c0_14, %c0_15] : memref<64x96xbf16, #tpu.memory_space<vmem>>, vector<64x96xbf16>
    %cst_16 = arith.constant dense<0.000000e+00> : vector<2x96xf32>
    %18 = tpu.matmul %16, %17, %cst_16 {dimension_numbers = #tpu.dot_dimension_numbers<[1], [0], [0], [1], [0, 0, 1, 1], [], []>} : vector<2x64xbf16>, vector<64x96xbf16>, vector<2x96xf32> -> vector<2x96xf32>
    %c0_17 = arith.constant 0 : index
    %c0_18 = arith.constant 0 : index
    %19 = vector.load %arg1[%c0_17, %c0_18] : memref<16x2xf32, #tpu.memory_space<vmem>>, vector<16x2xf32>
    %cst_19 = arith.constant dense<0.000000e+00> : vector<16x96xf32>
    %20 = tpu.matmul %19, %18, %cst_19 {dimension_numbers = #tpu.dot_dimension_numbers<[1], [0], [0], [1], [0, 0, 1, 1], [], []>} : vector<16x2xf32>, vector<2x96xf32>, vector<16x96xf32> -> vector<16x96xf32>
    %21 = vector.broadcast %1 : vector<1x96xf32> to vector<16x96xf32>
    %22 = arith.addf %20, %21 : vector<16x96xf32>
    %23 = arith.truncf %7 : vector<16x32xf32> to vector<16x32xbf16>
    %c0_20 = arith.constant 0 : index
    %c0_21 = arith.constant 0 : index
    %24 = vector.load %arg7[%c0_20, %c0_21] : memref<32x96xbf16, #tpu.memory_space<vmem>>, vector<32x96xbf16>
    %cst_22 = arith.constant dense<0.000000e+00> : vector<16x96xf32>
    %25 = tpu.matmul %23, %24, %cst_22 {dimension_numbers = #tpu.dot_dimension_numbers<[1], [0], [0], [1], [0, 0, 1, 1], [], []>} : vector<16x32xbf16>, vector<32x96xbf16>, vector<16x96xf32> -> vector<16x96xf32>
    %26 = vector.broadcast %2 : vector<1x96xf32> to vector<16x96xf32>
    %27 = arith.addf %25, %26 : vector<16x96xf32>
    %28 = vector.extract_strided_slice %22 {offsets = [0, 0], sizes = [16, 32], strides = [1, 1]} : vector<16x96xf32> to vector<16x32xf32>
    %29 = vector.extract_strided_slice %27 {offsets = [0, 0], sizes = [16, 32], strides = [1, 1]} : vector<16x96xf32> to vector<16x32xf32>
    %30 = arith.addf %28, %29 : vector<16x32xf32>
    %31 = arith.negf %30 : vector<16x32xf32>
    %32 = math.exp %31 : vector<16x32xf32>
    %cst_23 = arith.constant 1.000000e+00 : f32
    %33 = vector.broadcast %cst_23 : f32 to vector<16x32xf32>
    %34 = arith.addf %33, %32 : vector<16x32xf32>
    %35 = arith.divf %33, %34 : vector<16x32xf32>
    %36 = vector.extract_strided_slice %22 {offsets = [0, 32], sizes = [16, 32], strides = [1, 1]} : vector<16x96xf32> to vector<16x32xf32>
    %37 = vector.extract_strided_slice %27 {offsets = [0, 32], sizes = [16, 32], strides = [1, 1]} : vector<16x96xf32> to vector<16x32xf32>
    %38 = arith.addf %36, %37 : vector<16x32xf32>
    %39 = arith.negf %38 : vector<16x32xf32>
    %40 = math.exp %39 : vector<16x32xf32>
    %cst_24 = arith.constant 1.000000e+00 : f32
    %41 = vector.broadcast %cst_24 : f32 to vector<16x32xf32>
    %42 = arith.addf %41, %40 : vector<16x32xf32>
    %43 = arith.divf %41, %42 : vector<16x32xf32>
    %44 = vector.extract_strided_slice %22 {offsets = [0, 64], sizes = [16, 32], strides = [1, 1]} : vector<16x96xf32> to vector<16x32xf32>
    %45 = vector.extract_strided_slice %27 {offsets = [0, 64], sizes = [16, 32], strides = [1, 1]} : vector<16x96xf32> to vector<16x32xf32>
    %46 = arith.mulf %35, %45 : vector<16x32xf32>
    %47 = arith.addf %44, %46 : vector<16x32xf32>
    %48 = math.tanh %47 : vector<16x32xf32>
    %cst_25 = arith.constant 1.000000e+00 : f32
    %49 = vector.broadcast %cst_25 : f32 to vector<16x32xf32>
    %50 = arith.subf %49, %43 : vector<16x32xf32>
    %51 = arith.mulf %50, %48 : vector<16x32xf32>
    %52 = arith.mulf %43, %7 : vector<16x32xf32>
    %53 = arith.addf %51, %52 : vector<16x32xf32>
    %c0_26 = arith.constant 0 : index
    %c0_27 = arith.constant 0 : index
    %54 = vector.load %arg4[%c0_26, %c0_27] : memref<16x1xf32, #tpu.memory_space<vmem>>, vector<16x1xf32>
    %55 = vector.broadcast %54 : vector<16x1xf32> to vector<16x64xf32>
    %56 = vector.broadcast %6 : vector<1x64xf32> to vector<16x64xf32>
    %57 = arith.mulf %55, %56 : vector<16x64xf32>
    %58 = math.cos %57 : vector<16x64xf32>
    %59 = arith.truncf %58 : vector<16x64xf32> to vector<16x64xbf16>
    %c0_28 = arith.constant 0 : index
    %c0_29 = arith.constant 0 : index
    %60 = vector.load %arg8[%c0_28, %c0_29] : memref<64x32xbf16, #tpu.memory_space<vmem>>, vector<64x32xbf16>
    %cst_30 = arith.constant dense<0.000000e+00> : vector<16x32xf32>
    %61 = tpu.matmul %59, %60, %cst_30 {dimension_numbers = #tpu.dot_dimension_numbers<[1], [0], [0], [1], [0, 0, 1, 1], [], []>} : vector<16x64xbf16>, vector<64x32xbf16>, vector<16x32xf32> -> vector<16x32xf32>
    %62 = vector.broadcast %3 : vector<1x32xf32> to vector<16x32xf32>
    %63 = arith.addf %61, %62 : vector<16x32xf32>
    %cst_31 = arith.constant 0.000000e+00 : f32
    %64 = vector.broadcast %cst_31 : f32 to vector<16x32xf32>
    %65 = arith.maximumf %63, %64 : vector<16x32xf32>
    %66 = arith.truncf %53 : vector<16x32xf32> to vector<16x32xbf16>
    %c0_32 = arith.constant 0 : index
    %c0_33 = arith.constant 0 : index
    %67 = vector.load %arg9[%c0_32, %c0_33] : memref<32x32xbf16, #tpu.memory_space<vmem>>, vector<32x32xbf16>
    %cst_34 = arith.constant dense<0.000000e+00> : vector<16x32xf32>
    %68 = tpu.matmul %66, %67, %cst_34 {dimension_numbers = #tpu.dot_dimension_numbers<[1], [0], [0], [1], [0, 0, 1, 1], [], []>} : vector<16x32xbf16>, vector<32x32xbf16>, vector<16x32xf32> -> vector<16x32xf32>
    %69 = vector.broadcast %4 : vector<1x32xf32> to vector<16x32xf32>
    %70 = arith.addf %68, %69 : vector<16x32xf32>
    %cst_35 = arith.constant 0.000000e+00 : f32
    %71 = vector.broadcast %cst_35 : f32 to vector<16x32xf32>
    %72 = arith.maximumf %70, %71 : vector<16x32xf32>
    %73 = arith.addf %53, %72 : vector<16x32xf32>
    %74 = arith.mulf %73, %65 : vector<16x32xf32>
    %75 = arith.truncf %74 : vector<16x32xf32> to vector<16x32xbf16>
    %c0_36 = arith.constant 0 : index
    %c0_37 = arith.constant 0 : index
    %76 = vector.load %arg10[%c0_36, %c0_37] : memref<32x16xbf16, #tpu.memory_space<vmem>>, vector<32x16xbf16>
    %cst_38 = arith.constant dense<0.000000e+00> : vector<16x16xf32>
    %77 = tpu.matmul %75, %76, %cst_38 {dimension_numbers = #tpu.dot_dimension_numbers<[1], [0], [0], [1], [0, 0, 1, 1], [], []>} : vector<16x32xbf16>, vector<32x16xbf16>, vector<16x16xf32> -> vector<16x16xf32>
    %78 = vector.broadcast %5 : vector<1x16xf32> to vector<16x16xf32>
    %79 = arith.addf %77, %78 : vector<16x16xf32>
    %c0_39 = arith.constant 0 : index
    %c0_40 = arith.constant 0 : index
    %80 = vector.load %arg12[%c0_39, %c0_40] : memref<16x16xf32, #tpu.memory_space<vmem>>, vector<16x16xf32>
    tpu.vector_store %arg12[%c0_39, %c0_40], %79 {strides = array<i32>} : memref<16x16xf32, #tpu.memory_space<vmem>>, vector<16x16xf32>,
    %c0_41 = arith.constant 0 : index
    %c0_42 = arith.constant 0 : index
    %81 = vector.load %arg13[%c0_41, %c0_42] : memref<16x32xf32, #tpu.memory_space<vmem>>, vector<16x32xf32>
    tpu.vector_store %arg13[%c0_41, %c0_42], %53 {strides = array<i32>} : memref<16x32xf32, #tpu.memory_space<vmem>>, vector<16x32xf32>,
    return
  }
  func.func @transform_0(%arg0: i32) -> (i32, i32) {
    %c0_i32 = arith.constant 0 : i32
    %c0_i32_0 = arith.constant 0 : i32
    %c0_i32_1 = arith.constant 0 : i32
    return %c0_i32, %c0_i32_0 : i32, i32
  }
  func.func @transform_1(%arg0: i32) -> (i32, i32) {
    %c0_i32 = arith.constant 0 : i32
    %c0_i32_0 = arith.constant 0 : i32
    return %arg0, %c0_i32 : i32, i32
  }
  func.func @transform_2(%arg0: i32) -> (i32, i32) {
    %c0_i32 = arith.constant 0 : i32
    %c0_i32_0 = arith.constant 0 : i32
    return %arg0, %c0_i32 : i32, i32
  }
  func.func @transform_3(%arg0: i32) -> (i32, i32) {
    %c0_i32 = arith.constant 0 : i32
    %c0_i32_0 = arith.constant 0 : i32
    return %arg0, %c0_i32 : i32, i32
  }
  func.func @transform_4(%arg0: i32) -> (i32, i32) {
    %c0_i32 = arith.constant 0 : i32
    %c0_i32_0 = arith.constant 0 : i32
    %c0_i32_1 = arith.constant 0 : i32
    return %c0_i32, %c0_i32_0 : i32, i32
  }
  func.func @transform_5(%arg0: i32) -> (i32, i32) {
    %c0_i32 = arith.constant 0 : i32
    %c0_i32_0 = arith.constant 0 : i32
    %c0_i32_1 = arith.constant 0 : i32
    return %c0_i32, %c0_i32_0 : i32, i32
  }
  func.func @transform_6(%arg0: i32) -> (i32, i32) {
    %c0_i32 = arith.constant 0 : i32
    %c0_i32_0 = arith.constant 0 : i32
    %c0_i32_1 = arith.constant 0 : i32
    return %c0_i32, %c0_i32_0 : i32, i32
  }
  func.func @transform_7(%arg0: i32) -> (i32, i32) {
    %c0_i32 = arith.constant 0 : i32
    %c0_i32_0 = arith.constant 0 : i32
    %c0_i32_1 = arith.constant 0 : i32
    return %c0_i32, %c0_i32_0 : i32, i32
  }
  func.func @transform_8(%arg0: i32) -> (i32, i32) {
    %c0_i32 = arith.constant 0 : i32
    %c0_i32_0 = arith.constant 0 : i32
    %c0_i32_1 = arith.constant 0 : i32
    return %c0_i32, %c0_i32_0 : i32, i32
  }
  func.func @transform_9(%arg0: i32) -> (i32, i32) {
    %c0_i32 = arith.constant 0 : i32
    %c0_i32_0 = arith.constant 0 : i32
    %c0_i32_1 = arith.constant 0 : i32
    return %c0_i32, %c0_i32_0 : i32, i32
  }
  func.func @transform_10(%arg0: i32) -> (i32, i32) {
    %c0_i32 = arith.constant 0 : i32
    %c0_i32_0 = arith.constant 0 : i32
    %c0_i32_1 = arith.constant 0 : i32
    return %c0_i32, %c0_i32_0 : i32, i32
  }
  func.func @transform_11(%arg0: i32) -> (i32, i32) {
    %c0_i32 = arith.constant 0 : i32
    %c0_i32_0 = arith.constant 0 : i32
    return %arg0, %c0_i32 : i32, i32
  }
  func.func @transform_12(%arg0: i32) -> (i32, i32) {
    %c0_i32 = arith.constant 0 : i32
    %c0_i32_0 = arith.constant 0 : i32
    return %arg0, %c0_i32 : i32, i32
  }
}

</mosaic_0001>

<bundles_post_ra>
// kernel: riqn_forward.1
= control target key start
LH: loop header
LB: loop body
LE: loop exit
PB: predicated region body
PF: predicated region fallthrough
CT: control target
= control target key end

     0   :  { %v1110_v1 = vmov 0.0   ;;  %vm1111_vm0 = vmmov 0   ;;  %vm65_vm1 = vcmask 130048   ;;  %s1483_s0 = inlined_call_operand.vmem [shape: f32[16,2], index: 0, kind: input, shape index: {}]   ;;  %s1484_s1 = inlined_call_operand.vmem [shape: f32[2,16], index: 1, kind: input, shape index: {}]   ;;  %s1485_s2 = inlined_call_operand.vmem [shape: f32[16,32], index: 2, kind: input, shape index: {}, may-alias: {2,12}]   ;;  %s1486_s3 = inlined_call_operand.vmem [shape: f32[16,1], index: 3, kind: input, shape index: {}]   ;;  %s1487_s4 = inlined_call_operand.vmem [shape: bf16[16,64], index: 4, kind: input, shape index: {}]   ;;  %s1488_s5 = inlined_call_operand.vmem [shape: bf16[64,96], index: 5, kind: input, shape index: {}]   ;;  %s1489_s6 = inlined_call_operand.vmem [shape: bf16[32,96], index: 6, kind: input, shape index: {}]   ;;  %s1490_s7 = inlined_call_operand.vmem [shape: bf16[64,32], index: 7, kind: input, shape index: {}]   ;;  %s1491_s8 = inlined_call_operand.vmem [shape: bf16[32,32], index: 8, kind: input, shape index: {}]   ;;  %s1492_s9 = inlined_call_operand.vmem [shape: bf16[32,16], index: 9, kind: input, shape index: {}]   ;;  %s1493_s10 = inlined_call_operand.vmem [shape: f32[7,96], index: 10, kind: input, shape index: {}]   ;;  %s1494_s11 = inlined_call_operand.hbm [shape: f32[16,16], index: 11, kind: output, shape index: {0}]   ;;  %s1495_s12 = inlined_call_operand.vmem [shape: f32[16,32], index: 12, kind: output, shape index: {1}, may-alias: {2,12}]  }
   0x1   :  { %v1051_v0 = vld [vmem:[%s1487_s4] sm:$0xff]   ;;  %967 = vmatprep.subr.bf16.mxu0 %v1110_v1  ;;  %973 = vmatprep.subr.bf16.mxu1 %v1110_v1  ;;  %v1053_v5 = vld [vmem:[%s1488_s5 + $0x8] sm:$0xff]  }
   0x2   :  { %v51_v2 = vld [vmem:[%s1484_s1] sm:$0x3]  ;;  %968 = vmatpush3.bf16.msra.mxu0 %v1051_v0  ;;  %969 = vmatprep.mubr.msk.bf16.mxu0 %vm1111_vm0, %v1110_v1 }
   0x3   :  { %v52_v3 = vpack.c.bf16 %v51_v2, %v51_v2  ;;  %v1052_v4 = vld [vmem:[%s1488_s5] sm:$0xff]   ;;  %981 = vmatprep.mubr.msk.bf16.mxu1 %vm1111_vm0, %v1110_v1 }
   0x4   :  { %974 = vmatpush3.bf16.msra.mxu1 %v1052_v4 }
   0x5   :  { %970 = vmatmul.mubr.msk.bf16.vlgmr.msra.gmra.mrb[0].mxu0 %vm65_vm1, %v52_v3  ;;  %975 = vmatprep.subr.bf16.mxu1 %v1110_v1 }
   0x8   :  { %976 = vmatpush3.bf16.msra.mxu1 %v1053_v5 }
   0x9   :  { %977 = vmatprep.subr.bf16.mxu1 %v1110_v1 }
   0xa   :  { %18 = vsyncpa [#allocation3], 0  ;;  %v1054_v6 = vld [vmem:[%s1488_s5 + $0x10] sm:$0xff]   ;;  %v1055_v7 = vld [vmem:[%s1488_s5 + $0x18] sm:$0xff]   ;;  %vm143_vm2 = vcmask 523264   ;;  %vm193_vm3 = vcmask 15360  }
   0xb   :  { %v902_v8 = vld [vmem:[%s1493_s10] ss:$0 sm:$0xff]  ;;  %vm200_vm4 = vcmask 1041408   ;;  %v188_v18 = vld [vmem:[%s1483_s0 + $0x8] sm:$0xff]  ;;  %vm300_vm5 = vcmask 261120   ;;  %v1112_v29 = vmov 0  }
   0xc   :  { %978 = vmatpush3.bf16.msra.mxu1 %v1054_v6  ;;  %v187_v16 = vld [vmem:[%s1483_s0] sm:$0xff]  ;;  %v1057_v23 = vld [vmem:[%s1489_s6 + $0x8] sm:$0xff]   ;;  %1050 = vset.pattern.permute.xlu1 %v1112_v29  ;;  %s1113_s25 = smov 64   ;;  %v1114_v5 = vmov 2102212464   ;;  %s1120_s20 = smov 96  }
   0xd   :  { %979 = vmatprep.subr.bf16.mxu1 %v1110_v1  ;;  %987 = vmatprep.mubr.msk.f32.mxu0 %vm193_vm3, %v187_v16  ;;  %v1056_v19 = vld [vmem:[%s1489_s6] sm:$0xff]   ;;  %v1248_v25 = vld [vmem:[%s1485_s2 + $0x8] sm:$0xff]  ;;  %v1118_v16 = vmov 2475754826   ;;  %s1121_s23 = smov 32  }
   0xe   :  { %v1243_v24 = vld [vmem:[%s1485_s2] sm:$0xff]  ;;  %1049 = vset.pattern.permute.xlu0 %v1112_v29  ;;  %v406_v55 = vld [vmem:[%s1486_s3 + $0x8] sm:$0xff] }
   0xf   :  { %v279_v26 = vpack.c.bf16 %v1248_v25, %v1243_v24  ;;  %v914_v30 = vld [vmem:[%s1493_s10 + $0x2] ss:$0 sm:$0xff]  ;;  %v910_v38 = vld [vmem:[%s1493_s10 + $0x1] ss:$0 sm:$0xff]  ;;  %v1284_v56 = vld [vmem:[%s1493_s10 + $0x6] ss:$0 sm:$0xff] }
  0x10   :  { %980 = vmatpush3.bf16.msra.mxu1 %v1055_v7  ;;  %v405_v37 = vld [vmem:[%s1486_s3] sm:$0xff]  ;;  %v1059_v4 = vld [vmem:[%s1490_s7 + $0x8] sm:$0xff]   ;;  %v1115_v7 = vmov 920167782   ;;  %s1122_s3 = smov [#allocation2]  }
  0x11   :  { %998 = vmatprep.subr.bf16.mxu1 %v1110_v1  ;;  %v1058_v3 = vld [vmem:[%s1490_s7] sm:$0xff]   ;;  %s887_s14 = sshll.u32 %s1122_s3, 4  ;;  %s888_s14 = int_to_ptr.vmem [resolvable:$true] %s887_s14 }
  0x12   :  { %s1086_s5 = scalar_lea.vmem %s888_s14, 256  ;;  %p1091_p1 = scmp.lt.s32.totalorder %s888_s14, %s888_s14 }
  0x13   :  { %p1087_p0 = scmp.ne.s32.totalorder %s888_s14, %s1086_s5  ;;  %p1092_p2 = scmp.lt.s32.totalorder %s1086_s5, %s1086_s5 }
  0x15   :  { %p1093_p3 = por %p1092_p2, %p1091_p1 }
  0x17   :  { %p1094_p4 = pnand %p1093_p3, %p1087_p0 }
  0xd8   :  { %v103_v9 = vpop.f32.mrb[0].mxu0 }
  0xd9   :  { %v104_v10 = vadd.f32 %v902_v8, %v103_v9  ;;  %v971_v11 = vpop.f32.mrb[1].mxu0 }
  0xda   :  { %v106_v12 = vpop.f32.mrb[2].mxu0 }
  0xdb   :  { %v109_v13 = vmax.f32 %v104_v10, 0.0  ;;  %v972_v14 = vpop.f32.mrb[3].mxu0  ;;  %v1116_v12 = vmov 1326507024  }
  0xdc   :  { %v1117_v14 = vmov 683565275  }
  0xdd   :  { %v110_v15 = vpack.c.bf16 %v109_v13, %v109_v13 }
  0xdf   :  { %982 = vmatmul.mubr.msk.bf16.vlgmr.msra.gmra.mrb[0].mxu1 %vm143_vm2, %v110_v15 }
  0xe0   :  { %1006 = vmatprep.mubr.msk.bf16.mxu1 %vm1111_vm0, %v1110_v1  ;;  %999 = vmatpush3.bf16.msra.mxu1 %v1058_v3 }
  0xe1   :  { %1000 = vmatprep.subr.bf16.mxu1 %v1110_v1 }
  0xe4   :  { %1001 = vmatpush3.bf16.msra.mxu1 %v1059_v4 }
  0xe5   :  { %1002 = vmatprep.subr.bf16.mxu1 %v1110_v1 }
 0x1b2   :  { %v181_v17 = vpop.f32.mrb[0].mxu1 }
 0x1b3   :  { %v983_v20 = vpop.f32.mrb[1].mxu1  ;;  %985 = vmatprep.subr.msk.mxu0 %vm200_vm4, %v181_v17 }
 0x1b4   :  { %v184_v21 = vpop.f32.mrb[2].mxu1  ;;  %986 = vmatpush3.msk.msra.mxu0 %vm200_vm4, %v181_v17 }
 0x1b5   :  { %v984_v22 = vpop.f32.mrb[3].mxu1  ;;  %990 = vmatprep.subr.bf16.mxu0 %v1110_v1  ;;  %988 = vmatmul.mubr.msk.f32.vlgmr.msra.gmra.mrb[4].mxu0 %vm193_vm3, %v188_v18 }
 0x1b6   :  { %991 = vmatpush3.bf16.msra.mxu0 %v1056_v19  ;;  %994 = vmatprep.mubr.msk.bf16.mxu0 %vm1111_vm0, %v1110_v1  ;;  %v1119_v19 = vmov 2131351028  }
 0x1b7   :  { %992 = vmatprep.subr.bf16.mxu0 %v1110_v1 }
 0x1ba   :  { %993 = vmatpush3.bf16.msra.mxu0 %v1057_v23 }
 0x1bb   :  { %1010 = vmatprep.subr.bf16.mxu0 %v1110_v1 }
 0x1bd   :  { %995 = vmatmul.mubr.msk.bf16.vlgmr.msra.gmra.mrb[8].mxu0 %vm300_vm5, %v279_v26 }
 0x1be   :  { %1014 = vmatprep.mubr.msk.bf16.mxu0 %vm1111_vm0, %v1110_v1 }
 0x288   :  { %v989_v27 = vpop.f32.mrb[4].mxu0 }
 0x289   :  { %v270_v28 = vpop.f32.mrb[5].mxu0  ;;  %v1269_v41 = vadd.f32 %v989_v27, %v910_v38 }
 0x28a   :  { %v1266_v39 = vadd.f32 %v910_v38, %v270_v28 }
 0x290   :  { %v338_v31 = vpop.f32.mrb[8].mxu0 }
 0x291   :  { %v339_v32 = vadd.f32 %v914_v30, %v338_v31  ;;  %v996_v33 = vpop.f32.mrb[9].mxu0 }
 0x292   :  { %v341_v34 = vpop.f32.mrb[10].mxu0 }
 0x293   :  { %361 = vrot.lane.b32.xlu0 %v339_v32, %s1113_s25  ;;  %v997_v35 = vpop.f32.mrb[11].mxu0  ;;  %v342_v36 = vadd.f32 %v914_v30, %v341_v34  ;;  %v345_v40 = vadd.f32 %v339_v32, %v1266_v39 }
 0x295   :  { %v918_v42 = vmul.f32 -1.442695, %v345_v40  ;;  %v346_v43 = vadd.f32 %v342_v36, %v1269_v41 }
 0x297   :  { %363 = vrot.lane.b32.xlu0 %v342_v36, %s1113_s25  ;;  %1066 = vpow2.f32 %v918_v42  ;;  %v919_v44 = vmul.f32 -1.442695, %v346_v43 }
 0x299   :  { %1068 = vpow2.f32 %v919_v44 }
 0x29b   :  { %409 = vperm.xlu0 %1049, %v405_v37  }
 0x2a1   :  { %v1067_v45 = vpop.eup %1066 }
 0x2a2   :  { %v353_v46 = vadd.f32 1.0, %v1067_v45 }
 0x2a3   :  { %v1069_v47 = vpop.eup %1068 }
 0x2a4   :  { %1070 = vrcp.f32 %v353_v46  ;;  %v354_v48 = vadd.f32 1.0, %v1069_v47 }
 0x2a6   :  { %1072 = vrcp.f32 %v354_v48 }
 0x2ae   :  { %v1272_v49 = vpop.eup %1070 }
 0x2b0   :  { %v1275_v52 = vpop.eup %1072 }
 0x305   :  { %v362_v50 = vpop.permute.xlu0 %361 }
 0x306   :  { %v367_v51 = vmul.f32 %v1272_v49, %v362_v50 }
 0x308   :  { %371 = vrot.lane.b32.xlu1 %v367_v51, %s1113_s25 }
 0x309   :  { %v364_v53 = vpop.permute.xlu0 %363 }
 0x30a   :  { %v368_v54 = vmul.f32 %v1275_v52, %v364_v53 }
 0x30c   :  { %373 = vrot.lane.b32.xlu1 %v368_v54, %s1113_s25 }
 0x310   :  { %414 = vperm.xlu1 %1050, %v406_v55  }
 0x31a   :  { %v410_v57 = vpop.permute.xlu0 %409 }
 0x31b   :  { %v1287_v58 = vmul.f32 %v1284_v56, %v410_v57 }
 0x31d   :  { %v426_v59 = vand.u32 2139095040, %v1287_v58  ;;  %v423_v9 = vand.u32 2147483647, %v1287_v58 }
 0x31f   :  { %v427_v60 = vshrl.u32 %v426_v59, 23  ;;  %v430_v26 = vand.u32 8388607, %v423_v9  ;;  %v1060_v59 = vld [vmem:[%s1490_s7 + $0x10] sm:$0xff]  }
 0x320   :  { %1003 = vmatpush3.bf16.msra.mxu1 %v1060_v59 }
 0x321   :  { %v921_v61 = vadd.s32 4294967169, %v427_v60  ;;  %v431_v32 = vor.u32 8388608, %v430_v26  ;;  %1004 = vmatprep.subr.bf16.mxu1 %v1110_v1 }
 0x323   :  { %v433_v62 = vadd.s32 1, %v921_v61  ;;  %v471_v38 = vshll.u32 %v431_v32, 8  ;;  %v1061_v61 = vld [vmem:[%s1490_s7 + $0x18] sm:$0xff]  }
 0x324   :  { %1005 = vmatpush3.bf16.msra.mxu1 %v1061_v61 }
 0x325   :  { %vm434_vm6 = vcmp.gt.s32.totalorder %v433_v62, 0 }
 0x326   :  { %v435_v63 = vsel %vm434_vm6, %v433_v62, 0 }
 0x327   :  { %v437_v0 = vand.u32 31, %v435_v63  ;;  %v436_v10 = vshrl.u32 %v435_v63, 5 }
 0x329   :  { %v438_v2 = vsub.s32 32, %v437_v0  ;;  %v449_v6 = vshll.u32 %v1114_v5, %v437_v0  ;;  %v452_v11 = vshll.u32 %v1115_v7, %v437_v0  ;;  %v440_v15 = vshll.u32 %v1117_v14, %v437_v0 }
 0x32a   :  { %v443_v17 = vshll.u32 %v1118_v16, %v437_v0  ;;  %v446_v21 = vshll.u32 %v1119_v19, %v437_v0  ;;  %vm458_vm7 = vcmp.lt.s32.totalorder %v436_v10, 4  ;;  %vm455_vm8 = vcmp.lt.s32.totalorder %v436_v10, 1 }
 0x32b   :  { %v450_v8 = vshrl.u32 %v1115_v7, %v438_v2  ;;  %v453_v13 = vshrl.u32 %v1116_v12, %v438_v2  ;;  %v441_v18 = vshrl.u32 %v1118_v16, %v438_v2  ;;  %v444_v20 = vshrl.u32 %v1119_v19, %v438_v2 }
 0x32c   :  { %v447_v22 = vshrl.u32 %v1114_v5, %v438_v2  ;;  %vm457_vm9 = vcmp.lt.s32.totalorder %v436_v10, 3  ;;  %vm456_vm10 = vcmp.lt.s32.totalorder %v436_v10, 2  ;;  %v439_v45 = vshrl.u32 %v1117_v14, %v438_v2 }
 0x32d   :  { %v451_v23 = vor.u32 %v450_v8, %v449_v6  ;;  %v454_v27 = vor.u32 %v453_v13, %v452_v11  ;;  %v442_v28 = vor.u32 %v441_v18, %v440_v15  ;;  %v445_v29 = vor.u32 %v444_v20, %v443_v17 }
 0x32e   :  { %v448_v30 = vor.u32 %v447_v22, %v446_v21 }
 0x32f   :  { %v464_v31 = vsel %vm458_vm7, %v451_v23, 920167782  ;;  %v468_v33 = vsel %vm458_vm7, %v454_v27, 1326507024  ;;  %v463_v34 = vsel %vm455_vm8, %v442_v28, %v445_v29  ;;  %v459_v50 = vsel %vm455_vm8, %v439_v45, %v442_v28 }
 0x330   :  { %v465_v35 = vsel %vm457_vm9, %v448_v30, %v464_v31  ;;  %v467_v36 = vsel %vm455_vm8, %v445_v29, %v448_v30  ;;  %v469_v37 = vsel %vm457_vm9, %v451_v23, %v468_v33  ;;  %v460_v48 = vsel %vm458_vm7, %v448_v30, 2102212464 }
 0x331   :  { %v466_v40 = vsel %vm456_vm10, %v463_v34, %v465_v35  ;;  %v470_v42 = vsel %vm456_vm10, %v467_v36, %v469_v37  ;;  %v461_v51 = vsel %vm457_vm9, %v445_v29, %v460_v48  ;;  %vm425_vm7 = vcmp.lt.s32.totalorder %v1287_v58, 0 }
 0x332   :  { %v1319_v43 = vmul.u32.u64.low %v471_v38, %v466_v40  ;;  %v1320_v44 = vmul.u32.u64.high %v471_v38, %v466_v40, %v1319_v43  ;;  %v1324_v46 = vmul.u32.u64.low %v471_v38, %v470_v42  ;;  %v1325_v47 = vmul.u32.u64.high %v471_v38, %v470_v42, %v1324_v46 }
 0x333   :  { %v462_v53 = vsel %vm456_vm10, %v459_v50, %v461_v51  ;;  %vm1399_vm9 = vcmp.le.f32.partialorder %v423_v9, 0.7853982 }
 0x334   :  { %v481_v54 = vadd.s32 1, %v1320_v44  ;;  %vm480_vm11 = vc.u32 %v1325_v47, %v1319_v43  ;;  %v478_v55 = vmul.u32 %v471_v38, %v462_v53 }
 0x336   :  { %v482_v57 = vsel %vm480_vm11, %v481_v54, %v1320_v44 }
 0x337   :  { %v483_v60 = vadd.s32 %v482_v57, %v478_v55 }
 0x339   :  { %v484_v0 = vadd.s32 536870912, %v483_v60 }
 0x33b   :  { %v1344_v4 = vshrl.u32 %v484_v0, 30 }
 0x33d   :  { %v486_v6 = vshll.u32 %v1344_v4, 30 }
 0x33f   :  { %v1348_v10 = vsub.s32 %v483_v60, %v486_v6 }
 0x341   :  { %v489_v13 = vsub.s32 0, %v1348_v10 }
 0x343   :  { %v922_v17 = vmin.u32 %v489_v13, %v1348_v10 }
 0x345   :  { %v491_v20 = vclz %v922_v17 }
 0x347   :  { %v923_v26 = vadd.s32 4294967294, %v491_v20 }
 0x349   :  { %vm924_vm13 = vcmp.lt.s32.totalorder %v923_v26, 0 }
 0x34a   :  { %v494_v35 = vsel %vm924_vm13, 0, %v923_v26 }
 0x37a   :  { %v372_v62 = vpop.permute.xlu1 %371 }
 0x37b   :  { %v377_v63 = vadd.f32 %v372_v62, %v1266_v39  ;;  %v1062_v39 = vld [vmem:[%s1491_s8] sm:$0xff]  }
 0x37c   :  { %1011 = vmatpush3.bf16.msra.mxu0 %v1062_v39  ;;  %v479_v39 = vadd.s32 %v1319_v43, %v1325_v47 }
 0x37d   :  { %1074 = vtanh.f32 %v377_v63  ;;  %1012 = vmatprep.subr.bf16.mxu0 %v1110_v1 }
 0x37e   :  { %v374_v2 = vpop.permute.xlu1 %373 }
 0x37f   :  { %v378_v3 = vadd.f32 %v374_v2, %v1269_v41  ;;  %v1063_v41 = vld [vmem:[%s1491_s8 + $0x8] sm:$0xff]  }
 0x380   :  { %1013 = vmatpush3.bf16.msra.mxu0 %v1063_v41 }
 0x381   :  { %1076 = vtanh.f32 %v378_v3  ;;  %1018 = vmatprep.subr.bf16.mxu0 %v1110_v1 }
 0x387   :  { %v1075_v8 = vpop.eup %1074 }
 0x388   :  { %385 = vrot.lane.b32.xlu1 %v1075_v8, %s1120_s20 }
 0x38b   :  { %v1077_v11 = vpop.eup %1076 }
 0x38c   :  { %395 = vrot.lane.b32.xlu1 %v1243_v24, %s1121_s23  ;;  %387 = vrot.lane.b32.xlu0 %v1077_v11, %s1120_s20  ;;  %v495_v11 = vsub.s32 32, %v494_v35 }
 0x38e   :  { %v497_v20 = vshrl.u32 %v479_v39, %v495_v11 }
 0x38f   :  { %v415_v15 = vpop.permute.xlu1 %414 }
 0x390   :  { %397 = vrot.lane.b32.xlu0 %v1248_v25, %s1121_s23  ;;  %v1365_v18 = vmul.f32 %v1284_v56, %v415_v15 }
 0x392   :  { %v529_v24 = vand.u32 2139095040, %v1365_v18  ;;  %v526_v22 = vand.u32 2147483647, %v1365_v18  ;;  %vm528_vm10 = vcmp.lt.s32.totalorder %v1365_v18, 0 }
 0x394   :  { %v530_v21 = vshrl.u32 %v529_v24, 23  ;;  %v533_v28 = vand.u32 8388607, %v526_v22  ;;  %v496_v24 = vshll.u32 %v1348_v10, %v494_v35  ;;  %vm1415_vm11 = vcmp.le.f32.partialorder %v526_v22, 0.7853982 }
 0x396   :  { %v925_v23 = vadd.s32 4294967169, %v530_v21  ;;  %v534_v56 = vor.u32 8388608, %v533_v28 }
 0x398   :  { %v536_v27 = vadd.s32 1, %v925_v23  ;;  %v574_v48 = vshll.u32 %v534_v56, 8 }
 0x39a   :  { %vm537_vm12 = vcmp.gt.s32.totalorder %v536_v27, 0 }
 0x39b   :  { %v538_v25 = vsel %vm537_vm12, %v536_v27, 0  ;;  %v498_v27 = vor.u32 %v497_v20, %v496_v24 }
 0x39c   :  { %v540_v29 = vand.u32 31, %v538_v25  ;;  %v539_v30 = vshrl.u32 %v538_v25, 5 }
 0x39d   :  { %v505_v47 = vcvt.s32.f32 %v498_v27 }
 0x39e   :  { %v541_v31 = vsub.s32 32, %v540_v29  ;;  %v543_v32 = vshll.u32 %v1117_v14, %v540_v29  ;;  %v546_v33 = vshll.u32 %v1118_v16, %v540_v29  ;;  %v549_v34 = vshll.u32 %v1119_v19, %v540_v29 }
 0x39f   :  { %v552_v36 = vshll.u32 %v1114_v5, %v540_v29  ;;  %v555_v37 = vshll.u32 %v1115_v7, %v540_v29  ;;  %vm558_vm14 = vcmp.lt.s32.totalorder %v539_v30, 1  ;;  %vm561_vm15 = vcmp.lt.s32.totalorder %v539_v30, 4 }
 0x3a0   :  { %v542_v38 = vshrl.u32 %v1117_v14, %v541_v31  ;;  %v544_v40 = vshrl.u32 %v1118_v16, %v541_v31  ;;  %v547_v42 = vshrl.u32 %v1119_v19, %v541_v31  ;;  %v550_v44 = vshrl.u32 %v1114_v5, %v541_v31 }
 0x3a1   :  { %v553_v45 = vshrl.u32 %v1115_v7, %v541_v31  ;;  %v556_v46 = vshrl.u32 %v1116_v12, %v541_v31  ;;  %vm559_vm3 = vcmp.lt.s32.totalorder %v539_v30, 2  ;;  %vm560_vm4 = vcmp.lt.s32.totalorder %v539_v30, 3 }
 0x3a2   :  { %v545_v50 = vor.u32 %v544_v40, %v543_v32  ;;  %v548_v51 = vor.u32 %v547_v42, %v546_v33  ;;  %v551_v53 = vor.u32 %v550_v44, %v549_v34  ;;  %v499_v12 = vsub.s32 4294967266, %v494_v35  ;;  %v935_v35 = vld [vmem:[%s1493_s10 + $0x4] ss:$0 sm:$0xff] }
 0x3a3   :  { %v554_v54 = vor.u32 %v553_v45, %v552_v36  ;;  %v557_v55 = vor.u32 %v556_v46, %v555_v37 }
 0x3a4   :  { %v562_v14 = vsel %vm558_vm14, %v542_v38, %v545_v50  ;;  %v563_v16 = vsel %vm561_vm15, %v551_v53, 2102212464  ;;  %v566_v57 = vsel %vm558_vm14, %v545_v50, %v548_v51  ;;  %v570_v19 = vsel %vm558_vm14, %v548_v51, %v551_v53 }
 0x3a5   :  { %v564_v59 = vsel %vm560_vm4, %v548_v51, %v563_v16  ;;  %v567_v5 = vsel %vm561_vm15, %v554_v54, 920167782  ;;  %v571_v60 = vsel %vm561_vm15, %v557_v55, 1326507024  ;;  %v500_v41 = vadd.s32 127, %v499_v12 }
 0x3a6   :  { %v568_v7 = vsel %vm560_vm4, %v551_v53, %v567_v5  ;;  %v572_v61 = vsel %vm560_vm4, %v554_v54, %v571_v60  ;;  %v565_v62 = vsel %vm559_vm3, %v562_v14, %v564_v59  ;;  %v509_v54 = vsub.s32 4, %v1344_v4 }
 0x3a7   :  { %v569_v63 = vsel %vm559_vm3, %v566_v57, %v568_v7  ;;  %v573_v0 = vsel %vm559_vm3, %v570_v19, %v572_v61  ;;  %v581_v13 = vmul.u32 %v574_v48, %v565_v62  ;;  %v501_v21 = vshll.u32 %v500_v41, 23 }
 0x3a8   :  { %v1383_v2 = vmul.u32.u64.low %v574_v48, %v573_v0  ;;  %v1384_v3 = vmul.u32.u64.high %v574_v48, %v573_v0, %v1383_v2  ;;  %v1386_v6 = vmul.u32.u64.low %v574_v48, %v569_v63  ;;  %v1387_v8 = vmul.u32.u64.high %v574_v48, %v569_v63, %v1386_v6 }
 0x3a9   :  { %v502_v28 = vor.u32 4788187, %v501_v21  ;;  %v510_v16 = vsel %vm425_vm7, %v509_v54, %v1344_v4  ;;  %vm515_vm3 = vweird.f32 %v1287_v58  ;;  %v1065_v54 = vld [vmem:[%s1492_s9 + $0x8] sm:$0xff]  }
 0x3aa   :  { %vm583_vm6 = vc.u32 %v1384_v3, %v1386_v6  ;;  %v584_v15 = vadd.s32 1, %v1387_v8  ;;  %v582_v10 = vadd.s32 %v1386_v6, %v1384_v3  ;;  %v512_v5 = vsel %vm1399_vm9, 0, %v510_v16 }
 0x3ab   :  { %v503_v43 = vand.u32 2147483647, %v502_v28  ;;  %v516_v62 = vand.u32 3, %v512_v5 }
 0x3ac   :  { %v585_v17 = vsel %vm583_vm6, %v584_v15, %v1387_v8 }
 0x3ad   :  { %v586_v23 = vadd.s32 %v585_v17, %v581_v13  ;;  %v506_v31 = vmul.f32 %v505_v47, %v503_v43  ;;  %vm518_vm12 = vcmp.eq.s32.totalorder %v516_v62, 0  ;;  %vm521_vm13 = vcmp.eq.s32.totalorder %v516_v62, 2 }
 0x3ae   :  { %vm517_vm14 = vcmp.lt.s32.totalorder %v516_v62, 2  ;;  %v939_v62 = vld [vmem:[%s1493_s10 + $0x5] ss:$0 sm:$0xff] }
 0x3af   :  { %v587_v26 = vadd.s32 536870912, %v586_v23  ;;  %v507_v34 = vxor.u32 2147483648, %v506_v31 }
 0x3b1   :  { %v588_v25 = vshrl.u32 %v587_v26, 30  ;;  %v508_v38 = vsel %vm425_vm7, %v507_v34, %v506_v31  ;;  %vm618_vm7 = vweird.f32 %v1365_v18 }
 0x3b2   :  { %v511_v48 = vsel %vm1399_vm9, %v1287_v58, %v508_v38  ;;  %v381_v58 = vsub.f32 1.0, %v1272_v49 }
 0x3b3   :  { %v589_v29 = vshll.u32 %v588_v25, 30  ;;  %1078 = vcosq.f32 %v511_v48  ;;  %v612_v59 = vsub.s32 4, %v588_v25 }
 0x3b4   :  { %1080 = vsinq.f32 %v511_v48 }
 0x3b5   :  { %v590_v56 = vsub.s32 %v586_v23, %v589_v29  ;;  %v613_v4 = vsel %vm528_vm10, %v612_v59, %v588_v25  ;;  %v382_v25 = vsub.f32 1.0, %v1275_v52 }
 0x3b6   :  { %v615_v22 = vsel %vm1415_vm11, 0, %v613_v4 }
 0x3b7   :  { %v592_v30 = vsub.s32 0, %v590_v56  ;;  %v619_v2 = vand.u32 3, %v615_v22 }
 0x3b9   :  { %v926_v32 = vmin.u32 %v592_v30, %v590_v56  ;;  %vm624_vm15 = vcmp.eq.s32.totalorder %v619_v2, 2  ;;  %vm621_vm4 = vcmp.eq.s32.totalorder %v619_v2, 0  ;;  %vm620_vm6 = vcmp.lt.s32.totalorder %v619_v2, 2 }
 0x3bb   :  { %v594_v33 = vclz %v926_v32 }
 0x3bd   :  { %v927_v36 = vadd.s32 4294967294, %v594_v33  ;;  %v1079_v61 = vpop.eup %1078 }
 0x3be   :  { %v1081_v12 = vpop.eup %1080  ;;  %v522_v0 = vxor.u32 2147483648, %v1079_v61 }
 0x3bf   :  { %vm928_vm8 = vcmp.lt.s32.totalorder %v927_v36, 0  ;;  %v519_v63 = vxor.u32 2147483648, %v1081_v12 }
 0x3c0   :  { %v597_v37 = vsel %vm928_vm8, 0, %v927_v36  ;;  %v523_v6 = vsel %vm521_vm13, %v522_v0, %v1081_v12 }
 0x3c1   :  { %v598_v40 = vsub.s32 32, %v597_v37  ;;  %v599_v42 = vshll.u32 %v590_v56, %v597_v37  ;;  %v602_v44 = vsub.s32 4294967266, %v597_v37  ;;  %v520_v3 = vsel %vm518_vm12, %v1079_v61, %v519_v63 }
 0x3c2   :  { %v524_v11 = vsel %vm517_vm14, %v520_v3, %v523_v6 }
 0x3c3   :  { %v600_v45 = vshrl.u32 %v582_v10, %v598_v40  ;;  %v603_v46 = vadd.s32 127, %v602_v44  ;;  %v525_v17 = vsel %vm515_vm3, nan, %v524_v11 }
 0x3c5   :  { %v601_v50 = vor.u32 %v600_v45, %v599_v42  ;;  %v604_v51 = vshll.u32 %v603_v46, 23 }
 0x3c7   :  { %v605_v9 = vor.u32 4788187, %v604_v51  ;;  %v608_v53 = vcvt.s32.f32 %v601_v50 }
 0x3c9   :  { %v606_v55 = vand.u32 2147483647, %v605_v9  ;;  %v1064_v9 = vld [vmem:[%s1492_s9] sm:$0xff]  }
 0x3cb   :  { %v609_v14 = vmul.f32 %v608_v53, %v606_v55 }
 0x3cd   :  { %v610_v19 = vxor.u32 2147483648, %v609_v14 }
 0x3cf   :  { %v611_v60 = vsel %vm528_vm10, %v610_v19, %v609_v14 }
 0x3d0   :  { %v614_v7 = vsel %vm1415_vm11, %v1365_v18, %v611_v60 }
 0x3d1   :  { %1082 = vcosq.f32 %v614_v7 }
 0x3d2   :  { %1084 = vsinq.f32 %v614_v7 }
 0x3db   :  { %v1083_v8 = vpop.eup %1082 }
 0x3dc   :  { %v1085_v39 = vpop.eup %1084  ;;  %v625_v41 = vxor.u32 2147483648, %v1083_v8 }
 0x3dd   :  { %v622_v13 = vxor.u32 2147483648, %v1085_v39 }
 0x3de   :  { %v626_v15 = vsel %vm624_vm15, %v625_v41, %v1085_v39 }
 0x3df   :  { %v623_v24 = vsel %vm621_vm4, %v1083_v8, %v622_v13 }
 0x3e0   :  { %v627_v20 = vsel %vm620_vm6, %v623_v24, %v626_v15 }
 0x3e1   :  { %v628_v21 = vsel %vm618_vm7, nan, %v627_v20 }
 0x3e2   :  { %v629_v23 = vpack.c.bf16 %v628_v21, %v525_v17 }
 0x3e4   :  { %1007 = vmatmul.mubr.msk.bf16.vlgmr.msra.gmra.mrb[4].mxu1 %vm143_vm2, %v629_v23 }
 0x3fa   :  { %v386_v26 = vpop.permute.xlu1 %385 }
 0x3fb   :  { %v391_v47 = vmul.f32 %v386_v26, %v381_v58 }
 0x3fe   :  { %v388_v27 = vpop.permute.xlu0 %387  ;;  %v396_v28 = vpop.permute.xlu1 %395 }
 0x3ff   :  { %v401_v29 = vmul.f32 %v1272_v49, %v396_v28  ;;  %v392_v18 = vmul.f32 %v388_v27, %v382_v25 }
 0x401   :  { %v403_v30 = vadd.f32 %v401_v29, %v391_v47 }
 0x402   :  { %v398_v43 = vpop.permute.xlu0 %397 }
 0x403   :  { %v402_v56 = vmul.f32 %v1275_v52, %v398_v43  ;;  %v929_v52 = vld [vmem:[%s1493_s10 + $0x3] ss:$0 sm:$0xff] }
 0x405   :  { %v404_v31 = vadd.f32 %v402_v56, %v392_v18 }
 0x407   :  { %v712_v32 = vpack.c.bf16 %v404_v31, %v403_v30 }
 0x409   :  { %722 = vrot.lane.b32.xlu1 %v712_v32, %s1120_s20 }
 0x47b   :  { %v723_v33 = vpop.permute.xlu1 %722 }
 0x47c   :  { %1015 = vmatmul.mubr.msk.bf16.vlgmr.msra.gmra.mrb[12].mxu0 %vm300_vm5, %v723_v33 }
 0x47d   :  { %1022 = vmatprep.mubr.msk.bf16.mxu0 %vm1111_vm0, %v1110_v1  ;;  %1019 = vmatpush3.bf16.msra.mxu0 %v1064_v9 }
 0x47e   :  { %1020 = vmatprep.subr.bf16.mxu0 %v1110_v1 }
 0x481   :  { %1021 = vmatpush3.bf16.msra.mxu0 %v1065_v54 }
 0x4b7   :  { %v703_v34 = vpop.f32.mrb[4].mxu1 }
 0x4b8   :  { %v1008_v36 = vpop.f32.mrb[5].mxu1  ;;  %v704_v44 = vadd.f32 %v929_v52, %v703_v34 }
 0x4b9   :  { %v706_v10 = vpop.f32.mrb[6].mxu1 }
 0x4ba   :  { %v1009_v49 = vpop.f32.mrb[7].mxu1  ;;  %v707_v50 = vadd.f32 %v929_v52, %v706_v10  ;;  %v710_v53 = vmax.f32 %v704_v44, 0.0 }
 0x4bc   :  { %v711_v55 = vmax.f32 %v707_v50, 0.0 }
 0x54f   :  { %v773_v37 = vpop.f32.mrb[12].mxu0 }
 0x550   :  { %v774_v38 = vadd.f32 %v935_v35, %v773_v37  ;;  %v1016_v40 = vpop.f32.mrb[13].mxu0 }
 0x551   :  { %v776_v42 = vpop.f32.mrb[14].mxu0 }
 0x552   :  { %v780_v45 = vmax.f32 %v774_v38, 0.0  ;;  %v777_v46 = vadd.f32 %v935_v35, %v776_v42  ;;  %v1017_v48 = vpop.f32.mrb[15].mxu0 }
 0x554   :  { %v781_v51 = vmax.f32 %v777_v46, 0.0  ;;  %784 = vrot.lane.b32.xlu0 %v780_v45, %s1121_s23 }
 0x556   :  { %786 = vrot.lane.b32.xlu1 %v781_v51, %s1121_s23 }
 0x558   :  { %794 = vrot.lane.b32.xlu0 %v710_v53, %s1121_s23 }
 0x55a   :  { %796 = vrot.lane.b32.xlu1 %v711_v55, %s1121_s23 }
 0x55e   :  { %874 = vrot.lane.b32.xlu1 %v403_v30, %s1120_s20 }
 0x5c6   :  { %v785_v14 = vpop.permute.xlu0 %784 }
 0x5c7   :  { %v790_v19 = vadd.f32 %v785_v14, %v403_v30 }
 0x5c8   :  { %v787_v16 = vpop.permute.xlu1 %786 }
 0x5c9   :  { %v791_v59 = vadd.f32 %v787_v16, %v404_v31 }
 0x5ca   :  { %v795_v57 = vpop.permute.xlu0 %794 }
 0x5cb   :  { %v800_v60 = vmul.f32 %v795_v57, %v790_v19 }
 0x5cc   :  { %v797_v5 = vpop.permute.xlu1 %796 }
 0x5cd   :  { %v801_v7 = vmul.f32 %v797_v5, %v791_v59 }
 0x5cf   :  { %v802_v61 = vpack.c.bf16 %v801_v7, %v800_v60 }
 0x5d0   :  { %v875_v4 = vpop.permute.xlu1 %874 }
 0x5d1   :  { %880 = vst.msk [vmem:[%s1495_s12] sm:$0xff] %vm300_vm5, %v875_v4  ;;  %812 = vrot.lane.b32.xlu0 %v802_v61, %s1120_s20 }
 0x5d5   :  { %876 = vrot.lane.b32.xlu0 %v404_v31, %s1120_s20 }
 0x643   :  { %v813_v1 = vpop.permute.xlu0 %812 }
 0x644   :  { %1023 = vmatmul.mubr.msk.bf16.vlgmr.msra.gmra.mrb[16].mxu0 %vm300_vm5, %v813_v1 }
 0x647   :  { %v877_v12 = vpop.permute.xlu0 %876 }
 0x648   :  { %881 = vst.msk [vmem:[%s1495_s12 + $0x8] sm:$0xff] %vm300_vm5, %v877_v12 }
 0x717   :  { %v863_v22 = vpop.f32.mrb[16].mxu0 }
 0x718   :  { %v864_v63 = vadd.f32 %v939_v62, %v863_v22  ;;  %v1024_v0 = vpop.f32.mrb[17].mxu0 }
 0x719   :  { %v866_v2 = vpop.f32.mrb[18].mxu0 }
 0x71a   :  { %870 = vst.msk [vmem:[#allocation2] sm:$0xff] %vm65_vm1, %v864_v63  ;;  %v867_v3 = vadd.f32 %v939_v62, %v866_v2  ;;  %v1025_v6 = vpop.f32.mrb[19].mxu0 }
 0x71c   :  { %871 = vst.msk [vmem:[#allocation2 + $0x8] sm:$0xff] %vm65_vm1, %v867_v3 }
 0x71d   :  { %1097 = shalt.err (!%p1094_p4)
}
 0x71e   :  { %s1098_s15 = scalar_lea.hbm %s1494_s11, 256 }
 0x71f   :  { %p1099_p5 = scmp.ne.s32.totalorder %s1494_s11, %s1098_s15  ;;  %p1102_p6 = scmp.lt.u32.totalorder %s1098_s15, %s1494_s11 }
 0x721   :  { %p1104_p7 = pnand %p1102_p6, %p1099_p5 }
 0x723   :  { %1107 = shalt.err (!%p1104_p7)
}
 0x724   :  { %s1123_s20 = smov 128   ;;  %s1124_s7 = smov 8  }
 0x725   :  { %893 = dma.vmem_to_hbm [thread:$0]  %s888_s14, 256, %s1494_s11, [#allocation3], %s1123_s20, %s1123_s20, %s1124_s7  }
 0x726   :  { %1108 = dma.done.wait [#allocation3], 256  }
 0x727   :  { %1109 = vsyncadd [#allocation3], 4294967040 }
 0x728   :  { %901 = vsyncpa [#allocation3], 1 }

</bundles_post_ra>
